<compile_context>
chip_gen: v7x
topology: tpu7x:2x2x1
jax: 0.10.0
libtpu: 0.0.40
codegen_flags: <defaults>
</compile_context>

<pallas_src>
import functools
import math

import jax
import jax.numpy as jnp
from jax.experimental import pallas as pl
from jax.experimental.pallas import tpu as pltpu

_MIB = 1024 * 1024


def _round_up(a, b):
    return ((a + b - 1) // b) * b


def _vmem_capacity_bytes():
    """Best-effort VMEM capacity query; conservative (v7x-sized) fallback."""
    try:
        return int(pltpu.get_tpu_info().vmem_capacity_bytes)
    except Exception:
        return 64 * _MIB


def _pick_row_tile(rows, row_bytes, sublane, target_bytes, min_tiles=4):
    """Rows per grid step.

    Aims for ~target_bytes of (lane-padded) input per step, but never
    collapses the grid to a single step when there are enough rows: at least
    `min_tiles` steps are kept so the HBM->VMEM DMA double-buffers against
    compute and the 'parallel' grid axis can feed both v7x TensorCores.
    """
    if rows <= sublane:
        return rows                                        # single full-extent block
    gran = 128 if rows >= 128 * min_tiles else sublane     # lane-friendly when possible
    by_bytes = max(gran, (target_bytes // max(1, row_bytes)) // gran * gran)
    by_split = max(gran, _round_up(pl.cdiv(rows, min_tiles), gran))
    return min(by_bytes, by_split, rows)


def _gap_reduce_kernel(x_ref, o_ref, *, inv_hw):
    # x_ref: (row_tile, H*W) tile in its native dtype.
    # o_ref: (1, row_tile) lane-dense output tile (one mean per row).
    # f32 accumulation fused into the reduce (no full-tile f32 temporary).
    s = jnp.sum(x_ref[...], axis=-1, dtype=jnp.float32) * inv_hw
    o_ref[...] = s[None, :].astype(o_ref.dtype)


def _gap_matmul_kernel(x_ref, p_ref, o_ref, *, inv_hw):
    # x_ref: (grp_tile, g*H*W) lane-dense tile (g original rows per kernel row).
    # p_ref: (g*H*W, g) resident 0/1 pooling matrix (constant block index ->
    #        fetched once by the pipeline).
    # o_ref: (grp_tile, g) means; flattening gives original row-major order.
    s = jnp.dot(x_ref[...], p_ref[...], preferred_element_type=jnp.float32)
    o_ref[...] = (s * inv_hw).astype(o_ref.dtype)


def _gap_reduce_path(x2, rows, hw, itemsize, sublane, target_bytes,
                     vmem_cap_limit, inv_hw):
    """(rows, H*W) -> (rows,) means.  Used when H*W is already lane-dense
    (multiple of 128) or when the grouped layout does not divide rows."""
    hw_padded = _round_up(hw, 128)                         # physical lane padding
    row_tile = _pick_row_tile(rows, hw_padded * itemsize, sublane, target_bytes)
    num_tiles = pl.cdiv(rows, row_tile)
    # TODO(synk): for huge H*W (8-row padded block exceeding the VMEM budget)
    # add a second "arbitrary" grid axis over H*W with an f32 accumulator;
    # not needed for GoogLeNet-sized pools.

    need = (2 * row_tile * hw_padded * itemsize            # input double buffer
            + 2 * 8 * _round_up(row_tile, 128) * itemsize  # output double buffer
            + 4 * _MIB)                                    # headroom
    vmem_limit = int(min(vmem_cap_limit, max(need, 32 * _MIB)))

    kernel = functools.partial(_gap_reduce_kernel, inv_hw=inv_hw)
    out = pl.pallas_call(
        kernel,
        out_shape=jax.ShapeDtypeStruct((num_tiles, row_tile), x2.dtype),
        grid_spec=pltpu.PrefetchScalarGridSpec(
            num_scalar_prefetch=0,
            grid=(num_tiles,),
            in_specs=[pl.BlockSpec((row_tile, hw), lambda i: (i, 0))],
            out_specs=pl.BlockSpec((1, row_tile), lambda i: (i, 0)),
        ),
        compiler_params=pltpu.CompilerParams(
            dimension_semantics=("parallel",),
            vmem_limit_bytes=vmem_limit,
        ),
        cost_estimate=pl.CostEstimate(
            flops=rows * hw, transcendentals=0,
            bytes_accessed=rows * hw * itemsize + rows * itemsize),
    )(x2)
    return out.reshape(-1)[:rows]


def _gap_matmul_path(x2, pool, num_grp, g, ghw, rows, hw, itemsize, sublane,
                     target_bytes, vmem_cap_limit, inv_hw):
    """(rows//g, g*H*W) lane-dense view -> (rows,) means via MXU pooling matmul."""
    grp_tile = _pick_row_tile(num_grp, ghw * itemsize, sublane, target_bytes)
    num_tiles = pl.cdiv(num_grp, grp_tile)

    need = (2 * grp_tile * ghw * itemsize                           # input buffers
            + 2 * ghw * _round_up(g, 128) * itemsize                # pooling matrix
            + 2 * _round_up(grp_tile, 8) * _round_up(g, 128) * itemsize  # output
            + 4 * _MIB)                                             # headroom
    vmem_limit = int(min(vmem_cap_limit, max(need, 32 * _MIB)))

    kernel = functools.partial(_gap_matmul_kernel, inv_hw=inv_hw)
    out = pl.pallas_call(
        kernel,
        out_shape=jax.ShapeDtypeStruct((num_tiles * grp_tile, g), x2.dtype),
        grid_spec=pltpu.PrefetchScalarGridSpec(
            num_scalar_prefetch=0,
            grid=(num_tiles,),
            in_specs=[pl.BlockSpec((grp_tile, ghw), lambda i: (i, 0)),
                      pl.BlockSpec((ghw, g), lambda i: (0, 0))],
            out_specs=pl.BlockSpec((grp_tile, g), lambda i: (i, 0)),
        ),
        compiler_params=pltpu.CompilerParams(
            dimension_semantics=("parallel",),
            vmem_limit_bytes=vmem_limit,
        ),
        cost_estimate=pl.CostEstimate(
            flops=rows * hw, transcendentals=0,
            bytes_accessed=rows * hw * itemsize + rows * itemsize),
    )(x2, pool)
    return out.reshape(-1)[:rows]


def global_avg_pool2d(x):
    """Equivalent of nn.functional.avg_pool2d(x, kernel_size=x.size()[2:])."""
    n, c, h, w = x.shape
    rows, hw = n * c, h * w
    itemsize = jnp.dtype(x.dtype).itemsize
    sublane = max(8, 32 // itemsize)                   # 8 f32 / 16 bf16 / 32 int8

    vmem_cap = _vmem_capacity_bytes()
    small_vmem = vmem_cap <= 96 * _MIB                 # v7x-like (64 MiB per TC)
    target_bytes = (8 if small_vmem else 4) * _MIB     # bigger blocks at higher HBM BW
    vmem_cap_limit = (48 if small_vmem else 100) * _MIB
    inv_hw = float(1.0 / hw)

    # Group g rows per kernel row so the lane dim (g*H*W) is a multiple of 128:
    # fully dense DMAs instead of 128-padded strided transfers when H*W is
    # small (GoogLeNet's 7x7 = 49 -> g = 128).
    g = 128 // math.gcd(hw, 128)
    ghw = g * hw
    pool_bytes = ghw * g * itemsize
    use_matmul = (g > 1) and (rows % g == 0) and (2 * pool_bytes <= 8 * _MIB)

    if use_matmul:
        x2 = x.reshape(rows // g, ghw)                 # free view of contiguous NCHW
        seg = jnp.arange(ghw, dtype=jnp.int32) // hw
        pool = (seg[:, None] == jnp.arange(g, dtype=jnp.int32)[None, :]).astype(x.dtype)
        flat = _gap_matmul_path(x2, pool, rows // g, g, ghw, rows, hw, itemsize,
                                sublane, target_bytes, vmem_cap_limit, inv_hw)
    else:
        x2 = x.reshape(rows, hw)                       # free view of contiguous NCHW
        flat = _gap_reduce_path(x2, rows, hw, itemsize, sublane,
                                target_bytes, vmem_cap_limit, inv_hw)
    return flat.reshape(n, c, 1, 1)


if __name__ == "__main__":
    key = jax.random.PRNGKey(0)
    k1, k2, k3 = jax.random.split(key, 3)

    # 1) Small NCHW input, H*W a multiple of 128 -> lane-dense reduce path.
    x1 = jax.random.normal(k1, (2, 4, 16, 16), dtype=jnp.float32)
    o1 = jax.block_until_ready(global_avg_pool2d(x1))
    r1 = jnp.mean(x1, axis=(2, 3), keepdims=True)
    assert o1.shape == (2, 4, 1, 1), o1.shape
    assert o1.dtype == x1.dtype, o1.dtype
    assert jnp.allclose(o1, r1, atol=1e-5, rtol=1e-5), float(jnp.max(jnp.abs(o1 - r1)))

    # 2) GoogLeNet-style 7x7 global pool -> lane-dense MXU pooling-matmul path.
    x2 = jax.random.normal(k2, (2, 512, 7, 7), dtype=jnp.float32)
    o2 = jax.block_until_ready(global_avg_pool2d(x2))
    r2 = jnp.mean(x2, axis=(2, 3), keepdims=True)
    assert o2.shape == (2, 512, 1, 1), o2.shape
    # Tolerance accommodates MXU default-precision f32 passes.
    assert jnp.allclose(o2, r2, atol=1e-2, rtol=1e-2), float(jnp.max(jnp.abs(o2 - r2)))

    # 3) 7x7 pool with too few rows for the grouped layout -> fallback reduce path.
    x3 = jax.random.normal(k3, (2, 4, 7, 7), dtype=jnp.float32)
    o3 = jax.block_until_ready(global_avg_pool2d(x3))
    r3 = jnp.mean(x3, axis=(2, 3), keepdims=True)
    assert o3.shape == (2, 4, 1, 1), o3.shape
    assert jnp.allclose(o3, r3, atol=1e-5, rtol=1e-5), float(jnp.max(jnp.abs(o3 - r3)))

    print("KERNEL_OK")
</pallas_src>

<mosaic_0001>
module attributes {stable_mosaic.version = 11 : i64} {
  func.func @_gap_reduce_kernel(%arg0: i32, %arg1: memref<8x256xf32, #tpu.memory_space<vmem>>, %arg2: memref<1x8xf32, #tpu.memory_space<vmem>>) attributes {dimension_semantics = [#tpu.dimension_semantics<parallel>], iteration_bounds = array<i64: 1>, scalar_prefetch = 0 : i64, scratch_operands = 0 : i64, tpu.core_type = #tpu.core_type<tc>, window_params = [{transform_indices = @transform_0, window_bounds = array<i64: 8, 256>}, {transform_indices = @transform_1, window_bounds = array<i64: 1, 8>}]} {
    %c0 = arith.constant 0 : index
    %c0_0 = arith.constant 0 : index
    %0 = vector.load %arg1[%c0, %c0_0] : memref<8x256xf32, #tpu.memory_space<vmem>>, vector<8x256xf32>
    %cst = arith.constant dense<0.000000e+00> : vector<8xf32>
    %1 = vector.multi_reduction <add>, %0, %cst [1] : vector<8x256xf32> to vector<8xf32>
    %cst_1 = arith.constant 3.906250e-03 : f32
    %2 = vector.broadcast %cst_1 : f32 to vector<8xf32>
    %3 = arith.mulf %1, %2 : vector<8xf32>
    %4 = vector.shape_cast %3 : vector<8xf32> to vector<1x8xf32>
    %c0_2 = arith.constant 0 : index
    %c0_3 = arith.constant 0 : index
    %5 = vector.load %arg2[%c0_2, %c0_3] : memref<1x8xf32, #tpu.memory_space<vmem>>, vector<1x8xf32>
    tpu.vector_store %arg2[%c0_2, %c0_3], %4 {strides = array<i32>} : memref<1x8xf32, #tpu.memory_space<vmem>>, vector<1x8xf32>,
    return
  }
  func.func @transform_0(%arg0: i32) -> (i32, i32) {
    %c0_i32 = arith.constant 0 : i32
    %c0_i32_0 = arith.constant 0 : i32
    return %arg0, %c0_i32 : i32, i32
  }
  func.func @transform_1(%arg0: i32) -> (i32, i32) {
    %c0_i32 = arith.constant 0 : i32
    %c0_i32_0 = arith.constant 0 : i32
    return %arg0, %c0_i32 : i32, i32
  }
}

</mosaic_0001>

<bundles_post_ra>
// kernel: tpu_custom_call.1
= control target key start
LH: loop header
LB: loop body
LE: loop exit
PB: predicated region body
PF: predicated region fallthrough
CT: control target
= control target key end

     0   :  { %6 = vsyncpa [#allocation3], 0  ;;  %s138_s0 = inlined_call_operand.hbm [shape: f32[8,256], index: 0, kind: input, shape index: {}]   ;;  %s139_s1 = inlined_call_operand.hbm [shape: f32[1,8], index: 1, kind: output, shape index: {}]  }
   0x1   :  { %7 = vsyncpa [#allocation4], 0  ;;  %s102_s6 = smov [#allocation2]   ;;  %s54_s10 = scalar_lea.hbm %s138_s0, 256 }
   0x2   :  { %s14_s7 = sshll.u32 %s102_s6, 4  ;;  %p55_p0 = scmp.ne.s32.totalorder %s138_s0, %s54_s10  ;;  %s15_s7 = int_to_ptr.vmem [resolvable:$true] %s14_s7 }
   0x3   :  { %p58_p1 = scmp.lt.u32.totalorder %s54_s10, %s138_s0 }
   0x5   :  { %p60_p2 = pnand %p58_p1, %p55_p0 }
   0x7   :  { %63 = shalt.err (!%p60_p2)
}
   0x8   :  { %s64_s15 = scalar_lea.vmem %s15_s7, 256  ;;  %p69_p4 = scmp.lt.s32.totalorder %s15_s7, %s15_s7 }
   0x9   :  { %p65_p3 = scmp.ne.s32.totalorder %s15_s7, %s64_s15  ;;  %p70_p5 = scmp.lt.s32.totalorder %s64_s15, %s64_s15 }
   0xb   :  { %p71_p6 = por %p70_p5, %p69_p4 }
   0xd   :  { %p72_p7 = pnand %p71_p6, %p65_p3 }
   0xf   :  { %75 = shalt.err (!%p72_p7)
}
  0x10   :  { %17 = dma.hbm_to_vmem [thread:$0]  %s138_s0, 256, %s15_s7, [#allocation3]  }
  0x11   :  { %98 = dma.done.wait [#allocation3], 256  }
  0x12   :  { %99 = vsyncadd [#allocation3], 4294967040  ;;  %v21_v0 = vld [vmem:[#allocation2] sm:$0xff]  ;;  %v22_v1 = vld [vmem:[#allocation2 + $0x8] sm:$0xff]  ;;  %v28_v3 = vlaneseq  ;;  %s103_s18 = smov [#allocation5]   ;;  %vm35_vm0 = vcmask 57344  }
  0x13   :  { %v23_v2 = vadd.f32 %v22_v1, %v21_v0  ;;  %s43_s19 = sshll.u32 %s103_s18, 4  ;;  %s44_s19 = int_to_ptr.vmem [resolvable:$true] %s43_s19 }
  0x14   :  { %v29_v4 = vand.u32 127, %v28_v3  ;;  %v31_v5 = vshrl.u32 %v28_v3, 7  ;;  %s76_s20 = scalar_lea.vmem %s44_s19, 16  ;;  %s80_s0 = scalar_lea.vmem %s44_s19, 32 }
  0x15   :  { %24 = vadd.xlane.f32.xlu0 %v23_v2  ;;  %p77_p8 = scmp.ne.s32.totalorder %s44_s19, %s76_s20  ;;  %p81_p9 = scmp.lt.s32.totalorder %s44_s19, %s44_s19 }
  0x16   :  { %v32_v6 = vsub.s32 %v29_v4, %v31_v5  ;;  %p82_p10 = scmp.lt.s32.totalorder %s80_s0, %s76_s20 }
  0x18   :  { %p83_p11 = por %p82_p10, %p81_p9 }
  0x1a   :  { %p84_p12 = pnand %p83_p11, %p77_p8 }
  0xa2   :  { %v25_v7 = vpop.xlane.xlu0 %24 }
  0xa3   :  { %v26_v8 = vmul.f32 0.00390625, %v25_v7 }
  0xa5   :  { %v33_v9 = vrot.slane %v26_v8, %v32_v6 }
  0xa7   :  { %36 = vst.msk [vmem:[#allocation5] sm:$0x1] %vm35_vm0, %v33_v9 }
  0xa8   :  { %87 = shalt.err (!%p84_p12)
}
  0xa9   :  { %s88_s23 = scalar_lea.hbm %s139_s1, 16 }
  0xaa   :  { %p89_p13 = scmp.ne.s32.totalorder %s139_s1, %s88_s23  ;;  %p92_p0 = scmp.lt.u32.totalorder %s88_s23, %s139_s1 }
  0xac   :  { %p94_p1 = pnand %p92_p0, %p89_p13 }
  0xae   :  { %97 = shalt.err (!%p94_p1)
}
  0xaf   :  { %46 = dma.vmem_to_hbm [thread:$0]  %s44_s19, 16, %s139_s1, [#allocation4]  }
  0xb0   :  { %100 = dma.done.wait [#allocation4], 16  }
  0xb1   :  { %101 = vsyncadd [#allocation4], 4294967280 }
  0xb2   :  { %50 = vsyncpa [#allocation3], 1 }
  0xb3   :  { %51 = vsyncpa [#allocation4], 1 }

</bundles_post_ra>
